<compile_context>
chip_gen: v6e
topology: v6e:2x2x1
jax: 0.10.0
libtpu: 0.0.40
codegen_flags: <defaults>
</compile_context>

<pallas_src>
import functools

import jax
import jax.numpy as jnp
from jax.experimental import pallas as pl
from jax.experimental.pallas import tpu as pltpu


def _round_up(a, b):
    return (a + b - 1) // b * b


def _sublane_multiple(dtype) -> int:
    """Rows-per-sublane-tile for a given dtype (f32: 8, bf16: 16, int8/fp8: 32)."""
    itemsize = jnp.dtype(dtype).itemsize
    return {4: 8, 2: 16, 1: 32}.get(itemsize, 8)


def _pick_row_tile(n_rows: int, d_model: int, dtype) -> int:
    """Row-tile size: ~2 MiB blocks, VMEM-budgeted, megacore-friendly."""
    itemsize = jnp.dtype(dtype).itemsize
    sub = _sublane_multiple(dtype)
    row_bytes = d_model * itemsize

    target_block_bytes = 2 * 1024 * 1024   # 1–4 MiB sweet spot for HBM roofline
    vmem_budget_bytes = 12 * 1024 * 1024   # 2 in-bufs + 2 out-bufs, fits v5e 16 MiB

    tm = max(sub, (target_block_bytes // row_bytes) // sub * sub)
    # VMEM cap: double-buffered input + output = 4 * tm * row_bytes.
    tm_vmem = max(sub, (vmem_budget_bytes // (4 * row_bytes)) // sub * sub)
    tm = min(tm, tm_vmem)
    # Keep >= 4 grid blocks when n permits so v7x's 2 TensorCores both get work.
    tm = min(tm, max(sub, _round_up(pl.cdiv(n_rows, 4), sub)))
    # Never larger than the (rounded-up) row count.
    tm = min(tm, _round_up(n_rows, sub))
    return max(sub, tm)


def _layernorm_kernel(x_ref, scale_ref, shift_ref, o_ref, *, eps):
    # x_ref:     (TM, D) tile of token rows
    # scale_ref: (1, D)
    # shift_ref: (1, D)
    # o_ref:     (TM, D)
    x = x_ref[...].astype(jnp.float32)
    d = x.shape[-1]

    mean = jnp.mean(x, axis=-1, keepdims=True)
    xc = x - mean
    # torch.Tensor.std defaults to the unbiased estimator (ddof = 1).
    # (Requires d_model >= 2; d_model == 1 would divide by zero, as in torch.)
    var = jnp.sum(xc * xc, axis=-1, keepdims=True) / jnp.float32(d - 1)
    std = jnp.sqrt(var)

    # Per-row reciprocal (TM values) instead of a TM*D element-wise divide.
    inv = pl.reciprocal(std + jnp.float32(eps), approx=False)

    scale = scale_ref[...].astype(jnp.float32)
    shift = shift_ref[...].astype(jnp.float32)

    # Matches reference (x - mean) * scale / (std + eps) + shift to ~1 ulp.
    out = xc * inv * scale + shift
    o_ref[...] = out.astype(o_ref.dtype)


@functools.partial(jax.jit, static_argnames=("eps",))
def decoder_forward(x, memory, src_mask, tgt_mask, scale, shift, *, eps=1e-6):
    """Decoder.forward: (batch, seq, d_model) -> (batch, seq, d_model).

    # TODO(synk): the N cloned decoder sub-layers (`self.layers`) have no
    # definition in the spec (DecoderLayer is not provided), so only the final
    # LayerNorm is lowered; memory/src_mask/tgt_mask are accepted but unused.
    """
    del memory, src_mask, tgt_mask

    batch, seq, d_model = x.shape
    n = batch * seq
    x2 = x.reshape(n, d_model)
    scale2 = scale.reshape(1, d_model)
    shift2 = shift.reshape(1, d_model)

    itemsize = jnp.dtype(x.dtype).itemsize
    tm = _pick_row_tile(n, d_model, x.dtype)
    grid = (pl.cdiv(n, tm),)

    # Advisory cost model: streaming read + write of x plus params; per-row
    # sqrt + reciprocal count as transcendentals.
    cost = pl.CostEstimate(
        flops=7 * n * d_model,
        transcendentals=2 * n,
        bytes_accessed=2 * n * d_model * itemsize + 2 * d_model * itemsize,
    )

    out = pl.pallas_call(
        functools.partial(_layernorm_kernel, eps=eps),
        out_shape=jax.ShapeDtypeStruct((n, d_model), x.dtype),
        grid_spec=pltpu.PrefetchScalarGridSpec(
            num_scalar_prefetch=0,
            grid=grid,
            in_specs=[
                pl.BlockSpec((tm, d_model), lambda i: (i, 0)),
                pl.BlockSpec((1, d_model), lambda i: (0, 0)),
                pl.BlockSpec((1, d_model), lambda i: (0, 0)),
            ],
            out_specs=pl.BlockSpec((tm, d_model), lambda i: (i, 0)),
        ),
        compiler_params=pltpu.CompilerParams(
            dimension_semantics=("parallel",),
            vmem_limit_bytes=32 * 1024 * 1024,
        ),
        cost_estimate=cost,
    )(x2, scale2, shift2)
    return out.reshape(batch, seq, d_model)


if __name__ == "__main__":
    # Small shapes consistent with the module's forward signature.
    # d_model chosen as a multiple of 128 so the feature axis is lane-dense.
    batch, seq, src_seq, d_model = 2, 8, 8, 128
    eps = 1e-6

    key = jax.random.PRNGKey(0)
    kx, km, ks, kb = jax.random.split(key, 4)

    x = jax.random.normal(kx, (batch, seq, d_model), jnp.float32)
    memory = jax.random.normal(km, (batch, src_seq, d_model), jnp.float32)
    src_mask = jnp.ones((batch, 1, src_seq), jnp.float32)
    tgt_mask = jnp.tril(jnp.ones((seq, seq), jnp.float32))[None].repeat(batch, 0)

    # LayerNorm parameters (module inits scale=1, shift=0; use random values to
    # exercise the kernel math).
    scale = 1.0 + 0.1 * jax.random.normal(ks, (d_model,), jnp.float32)
    shift = 0.1 * jax.random.normal(kb, (d_model,), jnp.float32)

    out = decoder_forward(x, memory, src_mask, tgt_mask, scale, shift, eps=eps)
    jax.block_until_ready(out)

    # Pure-JAX reference with identical semantics (unbiased std, eps on std).
    mean = x.mean(-1, keepdims=True)
    std = jnp.std(x, axis=-1, keepdims=True, ddof=1)
    ref = (x - mean) * scale / (std + eps) + shift

    assert out.shape == (batch, seq, d_model)
    assert jnp.allclose(out, ref, atol=1e-5, rtol=1e-5)

    print("KERNEL_OK")
</pallas_src>

<mosaic_0001>
module attributes {stable_mosaic.version = 11 : i64} {
  func.func @_layernorm_kernel(%arg0: i32, %arg1: memref<8x128xf32, #tpu.memory_space<vmem>>, %arg2: memref<1x128xf32, #tpu.memory_space<vmem>>, %arg3: memref<1x128xf32, #tpu.memory_space<vmem>>, %arg4: memref<8x128xf32, #tpu.memory_space<vmem>>) attributes {dimension_semantics = [#tpu.dimension_semantics<parallel>], iteration_bounds = array<i64: 2>, scalar_prefetch = 0 : i64, scratch_operands = 0 : i64, tpu.core_type = #tpu.core_type<tc>, window_params = [{transform_indices = @transform_0, window_bounds = array<i64: 8, 128>}, {pipeline_mode = #tpu.pipeline_mode<synchronous>, transform_indices = @transform_1, window_bounds = array<i64: 1, 128>}, {pipeline_mode = #tpu.pipeline_mode<synchronous>, transform_indices = @transform_2, window_bounds = array<i64: 1, 128>}, {transform_indices = @transform_3, window_bounds = array<i64: 8, 128>}]} {
    %c0 = arith.constant 0 : index
    %c0_0 = arith.constant 0 : index
    %0 = vector.load %arg1[%c0, %c0_0] : memref<8x128xf32, #tpu.memory_space<vmem>>, vector<8x128xf32>
    %cst = arith.constant dense<0.000000e+00> : vector<8xf32>
    %1 = vector.multi_reduction <add>, %0, %cst [1] : vector<8x128xf32> to vector<8xf32>
    %2 = vector.shape_cast %1 : vector<8xf32> to vector<8x1xf32>
    %cst_1 = arith.constant 1.280000e+02 : f32
    %3 = vector.broadcast %cst_1 : f32 to vector<8x1xf32>
    %4 = arith.divf %2, %3 : vector<8x1xf32>
    %5 = vector.broadcast %4 : vector<8x1xf32> to vector<8x128xf32>
    %6 = arith.subf %0, %5 : vector<8x128xf32>
    %7 = arith.mulf %6, %6 : vector<8x128xf32>
    %cst_2 = arith.constant dense<0.000000e+00> : vector<8xf32>
    %8 = vector.multi_reduction <add>, %7, %cst_2 [1] : vector<8x128xf32> to vector<8xf32>
    %9 = vector.shape_cast %8 : vector<8xf32> to vector<8x1xf32>
    %cst_3 = arith.constant 1.270000e+02 : f32
    %10 = vector.broadcast %cst_3 : f32 to vector<8x1xf32>
    %11 = arith.divf %9, %10 : vector<8x1xf32>
    %12 = math.sqrt %11 : vector<8x1xf32>
    %cst_4 = arith.constant 9.99999997E-7 : f32
    %13 = vector.broadcast %cst_4 : f32 to vector<8x1xf32>
    %14 = arith.addf %12, %13 : vector<8x1xf32>
    %15 = tpu.reciprocal %14 : vector<8x1xf32> -> vector<8x1xf32>
    %c0_5 = arith.constant 0 : index
    %c0_6 = arith.constant 0 : index
    %16 = vector.load %arg2[%c0_5, %c0_6] : memref<1x128xf32, #tpu.memory_space<vmem>>, vector<1x128xf32>
    %c0_7 = arith.constant 0 : index
    %c0_8 = arith.constant 0 : index
    %17 = vector.load %arg3[%c0_7, %c0_8] : memref<1x128xf32, #tpu.memory_space<vmem>>, vector<1x128xf32>
    %18 = vector.broadcast %15 : vector<8x1xf32> to vector<8x128xf32>
    %19 = arith.mulf %6, %18 : vector<8x128xf32>
    %20 = vector.broadcast %16 : vector<1x128xf32> to vector<8x128xf32>
    %21 = arith.mulf %19, %20 : vector<8x128xf32>
    %22 = vector.broadcast %17 : vector<1x128xf32> to vector<8x128xf32>
    %23 = arith.addf %21, %22 : vector<8x128xf32>
    %c0_9 = arith.constant 0 : index
    %c0_10 = arith.constant 0 : index
    %24 = vector.load %arg4[%c0_9, %c0_10] : memref<8x128xf32, #tpu.memory_space<vmem>>, vector<8x128xf32>
    tpu.vector_store %arg4[%c0_9, %c0_10], %23 {strides = array<i32>} : memref<8x128xf32, #tpu.memory_space<vmem>>, vector<8x128xf32>,
    return
  }
  func.func @transform_0(%arg0: i32) -> (i32, i32) {
    %c0_i32 = arith.constant 0 : i32
    %c0_i32_0 = arith.constant 0 : i32
    return %arg0, %c0_i32 : i32, i32
  }
  func.func @transform_1(%arg0: i32) -> (i32, i32) {
    %c0_i32 = arith.constant 0 : i32
    %c0_i32_0 = arith.constant 0 : i32
    %c0_i32_1 = arith.constant 0 : i32
    return %c0_i32, %c0_i32_0 : i32, i32
  }
  func.func @transform_2(%arg0: i32) -> (i32, i32) {
    %c0_i32 = arith.constant 0 : i32
    %c0_i32_0 = arith.constant 0 : i32
    %c0_i32_1 = arith.constant 0 : i32
    return %c0_i32, %c0_i32_0 : i32, i32
  }
  func.func @transform_3(%arg0: i32) -> (i32, i32) {
    %c0_i32 = arith.constant 0 : i32
    %c0_i32_0 = arith.constant 0 : i32
    return %arg0, %c0_i32 : i32, i32
  }
}

</mosaic_0001>

<bundles_post_ra>
// kernel: decoder_forward.1
= control target key start
LH: loop header
LB: loop body
LE: loop exit
PB: predicated region body
PF: predicated region fallthrough
CT: control target
= control target key end

     0   :  { %8 = vsyncpa [#allocation3], 0  ;;  %s635_s0 = inlined_call_operand.hbm [shape: f32[16,128], index: 0, kind: input, shape index: {}]   ;;  %s636_s1 = inlined_call_operand.vmem [shape: f32[1,128], index: 1, kind: input, shape index: {}]   ;;  %s637_s2 = inlined_call_operand.vmem [shape: f32[1,128], index: 2, kind: input, shape index: {}]   ;;  %s638_s3 = inlined_call_operand.hbm [shape: f32[16,128], index: 3, kind: output, shape index: {}]  }
   0x1   :  { %10 = vsyncpa [#allocation3 + $0x1], 0 }
   0x2   :  { %11 = vsyncpa [#allocation4], 0 }
   0x3   :  { %13 = vsyncpa [#allocation4 + $0x1], 0  ;;  %s488_s12 = smov 0   ;;  %s490_s13 = smov 0  }
   0x4   :  { %s492_s14 = smov 0   ;;  %s494_s15 = smov 0  }
   0x5 LB: > { %s509_s16 = sadd.s32 4294967295, %s464_s15   ;;  %s308_s17 = sadd.s32 4294967294, %s464_s15   ;;  %s464_s15 = sphi %s494_s15, %s655_s15   ;;  %s460_s14 = sphi %s492_s14, %s654_s14   ;;  %s456_s13 = sphi %s490_s13, %s653_s13   ;;  %s452_s12 = sphi %s488_s12, %s652_s12  }
   0x6   : > { %s513_s18 = sadd.s32 1, %s464_s15   ;;  %s26_s19 = sadd.s32 1, %s460_s14 }
   0x7   : > { %s23_s20 = ssub.s32 %s464_s15, %s513_s18  ;;  %p33_p0 = scmp.ne.s32.totalorder %s460_s14, %s456_s13 }
   0x8   : > { %p24_p1 = scmp.eq.s32.totalorder %s23_s20, 0  ;;  %p34_p2 = scmp.eq.s32.totalorder %s464_s15, 0 }
   0x9   : > { %p39_p3 = scmp.ne.s32.totalorder %s456_s13, %s452_s12  ;;  %p40_p4 = scmp.eq.s32.totalorder %s509_s16, 0 }
   0xa   : > { %s525_s21 = scalar_select %p24_p1, %s460_s14, %s26_s19  }
   0xb   : > { %p527_p5 = por %p34_p2, %p33_p0  ;;  %p531_p6 = por %p40_p4, %p39_p3 }
   0xc   : > { %p105_p7 = scmp.eq.s32.totalorder %s509_s16, 1  ;;  %p111_p8 = scmp.eq.s32.totalorder %s308_s17, 1 }
   0xd   : > { %s642_s23 = scalar_select %p531_p6, 1, 0 }
   0xe   : > { %p334_p10 = scmp.lt.s32.totalorder %s464_s15, 2  ;;  %p538_p11 = por %p105_p7, %p33_p0 }
   0xf   : > { %p542_p12 = por %p111_p8, %p39_p3  ;;  %s137_s26 = sand.u32 1, %s460_s14  }
  0x10   : > { %s643_s24 = scalar_select %p538_p11, 1, 0 }
  0x11   : > { %s644_s25 = scalar_select %p542_p12, 1, 0 }
  0x12   : > { %s312_s27 = sshll.u32 %s464_s15, 7  ;;  %s311_s28 = sshll.u32 %s137_s26, 3 }
  0x13   : > { %s551_s4 = scalar_lea.hbm %s635_s0, %s312_s27  ;;  %s141_s5 = scalar_lea.vmem [#allocation2], %s311_s28 }
  0x14   : > { %s148_s6 = sshll.u32 %s141_s5, 4  ;;  %p555_p13 = pnand %p334_p10, %p527_p5  ;;  %s559_s6 = int_to_ptr.vmem [resolvable:$true] %s148_s6 }
  0x15   : > { %s138_s8 = scalar_lea.sflag [#allocation3], %s137_s26  ;;  %s372_s9 = scalar_lea.hbm %s551_s4, 128 }
  0x16   : > { %p373_p2 = scmp.ne.s32.totalorder %s551_s4, %s372_s9  ;;  %p374_p3 = pneg %p555_p13 }
  0x17   : > { %s377_s17 = scalar_lea.hbm %s635_s0, 256  ;;  %p378_p5 = scmp.lt.s32.totalorder %s551_s4, %s635_s0 }
  0x18   : > { %p375_p4 = pnand %p374_p3, %p373_p2  ;;  %p379_p8 = scmp.lt.s32.totalorder %s377_s17, %s372_s9 }
  0x1a   : > { %p376_p7 = pneg %p375_p4  ;;  %p380_p10 = por %p379_p8, %p378_p5 }
  0x1c   : > { %p381_p9 = pnand %p380_p10, %p376_p7 }
  0x1e   : > { %384 = shalt.err (!%p381_p9)
}
  0x1f   : > { %s385_s22 = scalar_lea.vmem %s559_s6, 128  ;;  %s466_s26 = smov [#allocation2]  }
  0x20   : > { %p386_p0 = scmp.ne.s32.totalorder %s559_s6, %s385_s22  ;;  %s390_s27 = sshll.u32 %s466_s26, 4  ;;  %s391_s27 = int_to_ptr.vmem [resolvable:$false] %s390_s27 }
  0x21   : > { %s392_s28 = scalar_lea.vmem %s391_s27, 256  ;;  %p393_p4 = scmp.lt.s32.totalorder %s559_s6, %s391_s27 }
  0x22   : > { %p388_p1 = pnand %p386_p0, %p374_p3  ;;  %p394_p12 = scmp.lt.s32.totalorder %s392_s28, %s385_s22 }
  0x24   : > { %p389_p2 = pneg %p388_p1  ;;  %p395_p11 = por %p394_p12, %p393_p4 }
  0x26   : > { %p396_p6 = pnand %p395_p11, %p389_p2 }
  0x28   : > { %399 = shalt.err (!%p396_p6)
}
  0x29   : > { %329 = dma.hbm_to_vmem [thread:$0]  (!%p555_p13), %s551_s4, 128, %s559_s6, %s138_s8  }
  0x2a   : > { %p646_p9 = scmp.lt.s32.totalorder %s464_s15, 3  ;;  %p647_p7 = scmp.ge.s32.totalorder %s464_s15, 1 }
  0x2c   : > { %p154_p0 = pnand %p647_p7, %p646_p9 }
  0x2d   : > { %s586_s29 = sand.u32 (!%p154_p0), 1, %s456_s13   ;;  %p648_p6 = scmp.ne.s32.totalorder (!%p154_p0), %s642_s23, 0 }
  0x2e   : > { %157 = sbr.rel (%p154_p0) target bundleno = 390 (0x186), region = 32  ;;  %s314_s30 = sshll.u32 (!%p154_p0), %s586_s29, 3 }
  0x2f   : > { %s160_s5 = scalar_lea.sflag (!%p154_p0), [#allocation3], %s586_s29  ;;  %s163_s9 = scalar_lea.vmem (!%p154_p0), [#allocation2], %s314_s30 }
  0x33   : > { %443 = dma.done.wait (%p648_p6), %s160_s5, 128  }
  0x34   : > { %445 = vsyncadd (%p648_p6), %s160_s5, 4294967168  ;;  %v186_v0 = vld [vmem:[%s163_s9] sm:$0xff]  ;;  %s319_s8 = sshll.u32 %s509_s16, 7  ;;  %s185_s10 = scalar_lea.vmem [#allocation5], %s314_s30 }
  0x35   : > { %187 = vadd.xlane.f32.xlu0 %v186_v0  ;;  %v316_v14 = vld [vmem:[%s636_s1] ss:$0 sm:$0xff]  ;;  %s238_s11 = sshll.u32 %s185_s10, 4  ;;  %s236_s20 = scalar_lea.hbm %s638_s3, %s319_s8  ;;  %s239_s11 = int_to_ptr.vmem [resolvable:$true] %s238_s11 }
  0x36   : > { %v317_v16 = vld [vmem:[%s637_s2] ss:$0 sm:$0xff]  ;;  %s225_s22 = scalar_lea.sflag [#allocation4], %s586_s29  ;;  %s400_s26 = scalar_lea.vmem %s239_s11, 128 }
  0x37   : > { %p401_p11 = scmp.ne.s32.totalorder %s239_s11, %s400_s26  ;;  %p649_p12 = scmp.ne.s32.totalorder %s643_s24, 0 }
  0x38   : > { %s467_s27 = smov [#allocation5]  }
  0x39   : > { %p402_p13 = pnand %p401_p11, %p649_p12  ;;  %s404_s28 = sshll.u32 %s467_s27, 4  ;;  %s405_s28 = int_to_ptr.vmem [resolvable:$false] %s404_s28 }
  0x3a   : > { %s406_s16 = scalar_lea.vmem %s405_s28, 256  ;;  %p407_p3 = scmp.lt.s32.totalorder %s239_s11, %s405_s28 }
  0x3b   : > { %p403_p1 = pneg %p402_p13  ;;  %p408_p5 = scmp.lt.s32.totalorder %s406_s16, %s400_s26 }
  0x3d   : > { %p409_p8 = por %p408_p5, %p407_p3 }
  0x3f   : > { %p410_p10 = pnand %p409_p8, %p403_p1 }
  0xbe   : > { %v188_v1 = vpop.xlane.xlu0 %187 }
  0xbf   : > { %v190_v2 = vmul.f32 0.0078125, %v188_v1 }
  0xc1   : > { %v191_v3 = vsub.f32 %v186_v0, %v190_v2 }
  0xc3   : > { %v192_v4 = vmul.f32 %v191_v3, %v191_v3 }
  0xc5   : > { %193 = vadd.xlane.f32.xlu0 %v192_v4 }
 0x14e   : > { %v194_v5 = vpop.xlane.xlu0 %193 }
 0x14f   : > { %v196_v6 = vmul.f32 0.007874016, %v194_v5 }
 0x151   : > { %368 = vrsqrt.f32 %v196_v6  ;;  %vm199_vm0 = vcmp.eq.f32.partialorder %v196_v6, inf  ;;  %v202_v9 = vand.u32 2147483648, %v196_v6  ;;  %vm201_vm1 = vcmp.eq.f32.partialorder %v196_v6, 0.0 }
 0x15e   : > { %v369_v7 = vpop.eup %368 }
 0x15f   : > { %v198_v8 = vmul.f32 %v369_v7, %v196_v6 }
 0x161   : > { %v200_v10 = vsel %vm199_vm0, %v196_v6, %v198_v8 }
 0x162   : > { %v203_v11 = vsel %vm201_vm1, %v202_v9, %v200_v10 }
 0x163   : > { %v204_v12 = vadd.f32 1e-06, %v203_v11 }
 0x165   : > { %370 = vrcp.f32 %v204_v12 }
 0x172   : > { %v371_v13 = vpop.eup %370 }
 0x173   : > { %v208_v15 = vmul.f32 %v371_v13, %v191_v3 }
 0x175   : > { %v215_v17 = vmul.f32 %v316_v14, %v208_v15 }
 0x177   : > { %v222_v18 = vadd.f32 %v317_v16, %v215_v17 }
 0x179   : > { %223 = vst [vmem:[%s185_s10] sm:$0xff] %v222_v18 }
 0x17a   : > { %413 = shalt.err (!%p410_p10)
}
 0x17b   : > { %s414_s30 = scalar_lea.hbm %s236_s20, 128  ;;  %s418_s9 = scalar_lea.hbm %s638_s3, 256 }
 0x17c   : > { %p415_p2 = scmp.ne.s32.totalorder %s236_s20, %s414_s30  ;;  %p419_p7 = scmp.lt.s32.totalorder %s236_s20, %s638_s3 }
 0x17d   : > { %p420_p0 = scmp.lt.s32.totalorder %s418_s9, %s414_s30 }
 0x17e   : > { %p416_p4 = pnand %p415_p2, %p649_p12 }
 0x17f   : > { %p421_p6 = por %p420_p0, %p419_p7 }
 0x180   : > { %p417_p9 = pneg %p416_p4 }
 0x182   : > { %p422_p11 = pnand %p421_p6, %p417_p9 }
 0x184   : > { %425 = shalt.err (!%p422_p11)
}
 0x185   : > { %324 = dma.vmem_to_hbm [thread:$0]  (%p649_p12), %s239_s11, 128, %s236_s20, %s225_s22  }
 0x186 PF: > { %s250_s6 = sand.u32 1, %s452_s12   ;;  %p650_p13 = scmp.ne.s32.totalorder %s644_s25, 0 }
 0x187   : > { %p651_p1 = scmp.ge.s32.totalorder %s464_s15, 2  ;;  %s251_s7 = scalar_lea.sflag [#allocation4], %s250_s6 }
 0x189   : > { %p331_p3 = pnand %p651_p1, %p650_p13 }
 0x18b   : > { %p332_p5 = pneg %p331_p3 }
 0x18d   : > { %447 = dma.done.wait (%p332_p5), %s251_s7, 128  }
 0x18e   : > { %449 = vsyncadd (%p332_p5), %s251_s7, 4294967168  ;;  %p16_p8 = scmp.ge.s32.totalorder %s513_s18, 4   ;;  %s652_s12 = smov %s456_s13 }
 0x18f   : > { %s653_s13 = smov %s460_s14  ;;  %s654_s14 = smov %s525_s21 }
 0x190   : > { %s655_s15 = smov %s513_s18  ;;  %18 = sbr.rel (!%p16_p8) target bundleno = 5 (0x5), region = 77 }
 0x195   :  { %256 = vsyncpa [#allocation3], 1 }
 0x196   :  { %258 = vsyncpa [#allocation3 + $0x1], 1 }
 0x197   :  { %259 = vsyncpa [#allocation4], 1 }
 0x198   :  { %261 = vsyncpa [#allocation4 + $0x1], 1 }

</bundles_post_ra>
